<compile_context>
chip_gen: v7x
topology: tpu7x:2x2x1
jax: 0.10.0
libtpu: 0.0.40
codegen_flags: <defaults>
</compile_context>

<pallas_src>
import jax
import jax.numpy as jnp
from jax.experimental import pallas as pl
from jax.experimental.pallas import tpu as pltpu

_LANE = 128
_TM_MIN = 512                          # below this, per-step overhead dominates
_TM_MAX = 4096
_TILE_PAIR_TARGET = 4 * 1024 * 1024    # HBM bytes per step for one x + one y tile


def _round_up(x, m):
    return (x + m - 1) // m * m


def _sublane(dtype):
    # Min second-to-last-dim tile per dtype: f32 -> 8, bf16 -> 16, int8/fp8 -> 32.
    return {4: 8, 2: 16, 1: 32}[jnp.dtype(dtype).itemsize]


def _vmem_capacity_bytes():
    # Per-TensorCore VMEM: 128 MiB on v5e/v6e, 64 MiB on v7x.
    try:
        return int(pltpu.get_tpu_info().vmem_capacity_bytes)
    except Exception:
        return 64 * 1024 * 1024        # conservative fallback (smallest generation)


def _dense_kernel(x_ref, w_ref, b_ref, o_ref):
    # y = x @ W + b : MXU matmul with f32 accumulation, fused VPU bias epilogue.
    acc = jnp.dot(x_ref[...], w_ref[...], preferred_element_type=jnp.float32)
    o_ref[...] = (acc + b_ref[...]).astype(o_ref.dtype)


def dense_pallas(x2d, w, b, *, mxu_input_dtype=None):
    """x2d: (N, F), w: (F, F_out), b: (F_out,) -> (N, F_out)."""
    out_dtype = x2d.dtype
    if mxu_input_dtype is not None:
        # For large, MXU-bound layers: bf16 operands run at the native MXU rate
        # on v6e/v7x and halve HBM read bytes + weight residency.  Accumulation
        # and the bias epilogue stay f32; the result is cast back to out_dtype.
        x2d = x2d.astype(mxu_input_dtype)
        w = w.astype(mxu_input_dtype)

    N, F = x2d.shape
    F_out = w.shape[1]
    b2d = b.reshape(1, F_out)

    x_item = jnp.dtype(x2d.dtype).itemsize
    w_item = jnp.dtype(w.dtype).itemsize
    b_item = jnp.dtype(b2d.dtype).itemsize
    o_item = jnp.dtype(out_dtype).itemsize
    sub = max(_sublane(x2d.dtype), _sublane(out_dtype))

    # --- VMEM budget (generation-aware) ------------------------------------
    # Weight/bias blocks are grid-invariant (constant index_map), so Mosaic
    # keeps them resident and skips per-step refetch; we still budget for two
    # copies in case the pipeliner double-buffers them.  VMEM accounting uses
    # lane-padded widths (tiles are padded to 128 lanes on chip).
    vmem_cap = _vmem_capacity_bytes()
    budget = int(vmem_cap * 0.75)                      # headroom for internal scratch
    fo_lanes = _round_up(F_out, _LANE)
    f_lanes = _round_up(F, _LANE)
    w_rows = _round_up(F, _sublane(w.dtype))
    resident = 2 * (w_rows * fo_lanes * w_item + 8 * fo_lanes * b_item)
    # TODO(synk): if the resident weight exceeds ~1/3 of the per-core budget
    # (hit much earlier on v7x's 64 MiB than on v5e/v6e), switch to a K / Fo
    # tiled variant with an f32 accumulator scratch and pl.when init/store,
    # or keep W in bf16 to halve residency.

    # --- Row tile: scale with feature width, clamp to the VMEM budget ------
    per_row_hbm = F * x_item + F_out * o_item          # streamed bytes per row
    per_row_vmem = f_lanes * x_item + fo_lanes * o_item
    tm = _TILE_PAIR_TARGET // max(per_row_hbm, 1)
    tm = max(_TM_MIN, min(_TM_MAX, tm))
    avail_for_tiles = max(budget - resident, 2 * sub * per_row_vmem)
    tm = min(tm, avail_for_tiles // (2 * per_row_vmem))  # double-buffered x + y
    tm = min(tm, _round_up(N, sub))                    # don't tile past the data
    tm = max(sub, tm // sub * sub)
    grid = (pl.cdiv(N, tm),)                           # ragged last tile is masked

    needed = resident + 2 * tm * per_row_vmem + (2 << 20)
    vmem_limit = int(min(max(2 * needed, 8 << 20), int(vmem_cap * 0.9)))

    cost = pl.CostEstimate(
        flops=2 * N * F * F_out,
        transcendentals=0,
        bytes_accessed=(N * F * x_item + F * F_out * w_item
                        + F_out * b_item + N * F_out * o_item),
    )

    return pl.pallas_call(
        _dense_kernel,
        out_shape=jax.ShapeDtypeStruct((N, F_out), out_dtype),
        grid=grid,
        in_specs=[
            # Streamed row tile; last dim = full F (full-dim blocks are legal
            # at any width, so no lane padding and no pad copies).
            pl.BlockSpec((tm, F), lambda i: (i, 0)),
            # Resident weight / bias: constant index_map -> fetched once.
            pl.BlockSpec((F, F_out), lambda i: (0, 0)),
            pl.BlockSpec((1, F_out), lambda i: (0, 0)),
        ],
        out_specs=pl.BlockSpec((tm, F_out), lambda i: (i, 0)),
        compiler_params=pltpu.CompilerParams(
            # Independent row tiles: shard across both TensorCores on v7x
            # (note: the resident weight is then duplicated per core).
            dimension_semantics=("parallel",),
            vmem_limit_bytes=vmem_limit,
        ),
        cost_estimate=cost,
    )(x2d, w, b2d)


def time_distributed_linear(input_seq, w, b, *, mxu_input_dtype=None):
    """Reproduces TimeDistributed(nn.Linear(F, F_out)).forward.

    input_seq: (B, T, *feat, F) with ndim > 2 (matching the torch assert).
    nn.Linear acts on the last dim, so all leading dims flatten into rows.
    returns:   (B, T, *feat, F_out)
    """
    assert input_seq.ndim > 2
    size = input_seq.shape
    F = size[-1]
    rows = 1
    for d in size[:-1]:
        rows *= d
    out2d = dense_pallas(input_seq.reshape(rows, F), w, b,
                         mxu_input_dtype=mxu_input_dtype)
    return out2d.reshape(size[:-1] + (w.shape[1],))


if __name__ == "__main__":
    B, T, F, F_OUT = 2, 8, 32, 64

    key = jax.random.PRNGKey(0)
    k_x, k_w, k_b, k_x2 = jax.random.split(key, 4)

    x = jax.random.normal(k_x, (B, T, F), dtype=jnp.float32)
    # Deterministic synthetic nn.Linear parameters (no checkpoint load).
    w = jax.random.normal(k_w, (F, F_OUT), dtype=jnp.float32) * 0.05
    b = jax.random.normal(k_b, (F_OUT,), dtype=jnp.float32) * 0.01

    out = jax.block_until_ready(time_distributed_linear(x, w, b))
    ref = (x.reshape(B * T, F) @ w + b).reshape(B, T, F_OUT)
    assert out.shape == (B, T, F_OUT)
    assert jnp.allclose(out, ref, atol=1e-5, rtol=1e-5)

    # Extra trailing feature dims: TimeDistributed hands (B*T, S, F) to Linear,
    # which still acts on the last dim only.
    x2 = jax.random.normal(k_x2, (2, 4, 3, F), dtype=jnp.float32)
    out2 = jax.block_until_ready(time_distributed_linear(x2, w, b))
    ref2 = (x2.reshape(-1, F) @ w + b).reshape(2, 4, 3, F_OUT)
    assert out2.shape == (2, 4, 3, F_OUT)
    assert jnp.allclose(out2, ref2, atol=1e-5, rtol=1e-5)

    # bf16 MXU path (intended for large, MXU-bound layers): f32 accumulate +
    # f32 bias epilogue; loose tolerance covers bf16 operand rounding.
    out_bf = jax.block_until_ready(
        time_distributed_linear(x, w, b, mxu_input_dtype=jnp.bfloat16))
    assert out_bf.shape == (B, T, F_OUT)
    assert jnp.allclose(out_bf.astype(jnp.float32), ref, atol=5e-2, rtol=5e-2)

    print("KERNEL_OK")
</pallas_src>

<mosaic_0001>
module attributes {stable_mosaic.version = 11 : i64} {
  func.func @_dense_kernel(%arg0: i32, %arg1: memref<16x32xf32, #tpu.memory_space<vmem>>, %arg2: memref<32x64xf32, #tpu.memory_space<vmem>>, %arg3: memref<1x64xf32, #tpu.memory_space<vmem>>, %arg4: memref<16x64xf32, #tpu.memory_space<vmem>>) attributes {dimension_semantics = [#tpu.dimension_semantics<parallel>], iteration_bounds = array<i64: 1>, scalar_prefetch = 0 : i64, scratch_operands = 0 : i64, tpu.core_type = #tpu.core_type<tc>, window_params = [{transform_indices = @transform_0, window_bounds = array<i64: 16, 32>}, {pipeline_mode = #tpu.pipeline_mode<synchronous>, transform_indices = @transform_1, window_bounds = array<i64: 32, 64>}, {pipeline_mode = #tpu.pipeline_mode<synchronous>, transform_indices = @transform_2, window_bounds = array<i64: 1, 64>}, {transform_indices = @transform_3, window_bounds = array<i64: 16, 64>}]} {
    %c0 = arith.constant 0 : index
    %c0_0 = arith.constant 0 : index
    %0 = vector.load %arg1[%c0, %c0_0] : memref<16x32xf32, #tpu.memory_space<vmem>>, vector<16x32xf32>
    %c0_1 = arith.constant 0 : index
    %c0_2 = arith.constant 0 : index
    %1 = vector.load %arg2[%c0_1, %c0_2] : memref<32x64xf32, #tpu.memory_space<vmem>>, vector<32x64xf32>
    %cst = arith.constant dense<0.000000e+00> : vector<16x64xf32>
    %2 = tpu.matmul %0, %1, %cst {dimension_numbers = #tpu.dot_dimension_numbers<[1], [0], [0], [1], [0, 0, 1, 1], [], []>} : vector<16x32xf32>, vector<32x64xf32>, vector<16x64xf32> -> vector<16x64xf32>
    %c0_3 = arith.constant 0 : index
    %c0_4 = arith.constant 0 : index
    %3 = vector.load %arg3[%c0_3, %c0_4] : memref<1x64xf32, #tpu.memory_space<vmem>>, vector<1x64xf32>
    %4 = vector.broadcast %3 : vector<1x64xf32> to vector<16x64xf32>
    %5 = arith.addf %2, %4 : vector<16x64xf32>
    %c0_5 = arith.constant 0 : index
    %c0_6 = arith.constant 0 : index
    %6 = vector.load %arg4[%c0_5, %c0_6] : memref<16x64xf32, #tpu.memory_space<vmem>>, vector<16x64xf32>
    tpu.vector_store %arg4[%c0_5, %c0_6], %5 {strides = array<i32>} : memref<16x64xf32, #tpu.memory_space<vmem>>, vector<16x64xf32>,
    return
  }
  func.func @transform_0(%arg0: i32) -> (i32, i32) {
    %c0_i32 = arith.constant 0 : i32
    %c0_i32_0 = arith.constant 0 : i32
    return %arg0, %c0_i32 : i32, i32
  }
  func.func @transform_1(%arg0: i32) -> (i32, i32) {
    %c0_i32 = arith.constant 0 : i32
    %c0_i32_0 = arith.constant 0 : i32
    %c0_i32_1 = arith.constant 0 : i32
    return %c0_i32, %c0_i32_0 : i32, i32
  }
  func.func @transform_2(%arg0: i32) -> (i32, i32) {
    %c0_i32 = arith.constant 0 : i32
    %c0_i32_0 = arith.constant 0 : i32
    %c0_i32_1 = arith.constant 0 : i32
    return %c0_i32, %c0_i32_0 : i32, i32
  }
  func.func @transform_3(%arg0: i32) -> (i32, i32) {
    %c0_i32 = arith.constant 0 : i32
    %c0_i32_0 = arith.constant 0 : i32
    return %arg0, %c0_i32 : i32, i32
  }
}

</mosaic_0001>

<bundles_post_ra>
// kernel: tpu_custom_call.1
= control target key start
LH: loop header
LB: loop body
LE: loop exit
PB: predicated region body
PF: predicated region fallthrough
CT: control target
= control target key end

     0   :  { %8 = vsyncpa [#allocation3], 0  ;;  %s337_s0 = inlined_call_operand.hbm [shape: f32[16,32], index: 0, kind: input, shape index: {}]   ;;  %s338_s1 = inlined_call_operand.hbm [shape: f32[32,64], index: 1, kind: input, shape index: {}]   ;;  %s339_s2 = inlined_call_operand.vmem [shape: f32[1,64], index: 2, kind: input, shape index: {}]   ;;  %s340_s3 = inlined_call_operand.hbm [shape: f32[16,64], index: 3, kind: output, shape index: {}]  }
   0x1   :  { %9 = vsyncpa [#allocation6], 0 }
   0x2   :  { %10 = vsyncpa [#allocation4], 0  ;;  %s264_s12 = smov [#allocation2]   ;;  %s192_s16 = scalar_lea.hbm %s337_s0, 256 }
   0x3   :  { %s16_s13 = sshll.u32 %s264_s12, 4  ;;  %p193_p0 = scmp.ne.s32.totalorder %s337_s0, %s192_s16  ;;  %s17_s13 = int_to_ptr.vmem [resolvable:$true] %s16_s13 }
   0x4   :  { %p196_p1 = scmp.lt.u32.totalorder %s192_s16, %s337_s0 }
   0x6   :  { %p198_p2 = pnand %p196_p1, %p193_p0 }
   0x8   :  { %201 = shalt.err (!%p198_p2)
}
   0x9   :  { %s202_s21 = scalar_lea.vmem %s17_s13, 256  ;;  %p207_p4 = scmp.lt.s32.totalorder %s17_s13, %s17_s13 }
   0xa   :  { %p203_p3 = scmp.ne.s32.totalorder %s17_s13, %s202_s21  ;;  %p208_p5 = scmp.lt.s32.totalorder %s202_s21, %s202_s21 }
   0xc   :  { %p209_p6 = por %p208_p5, %p207_p4 }
   0xe   :  { %p210_p7 = pnand %p209_p6, %p203_p3 }
  0x10   :  { %213 = shalt.err (!%p210_p7)
}
  0x11   :  { %s265_s22 = smov 128   ;;  %s266_s23 = smov 8  }
  0x12   :  { %22 = dma.hbm_to_vmem [thread:$0]  %s337_s0, 256, %s17_s13, [#allocation3], %s265_s22, %s265_s22, %s266_s23  }
  0x13   :  { %s267_s26 = smov [#allocation5]   ;;  %s214_s30 = scalar_lea.hbm %s338_s1, 512 }
  0x14   :  { %s28_s27 = sshll.u32 %s267_s26, 4  ;;  %p215_p8 = scmp.ne.s32.totalorder %s338_s1, %s214_s30  ;;  %s29_s27 = int_to_ptr.vmem [resolvable:$true] %s28_s27 }
  0x15   :  { %p218_p9 = scmp.lt.u32.totalorder %s214_s30, %s338_s1 }
  0x17   :  { %p220_p10 = pnand %p218_p9, %p215_p8 }
  0x19   :  { %223 = shalt.err (!%p220_p10)
}
  0x1a   :  { %s224_s8 = scalar_lea.vmem %s29_s27, 512  ;;  %p229_p12 = scmp.lt.s32.totalorder %s29_s27, %s29_s27 }
  0x1b   :  { %p225_p11 = scmp.ne.s32.totalorder %s29_s27, %s224_s8  ;;  %p230_p13 = scmp.lt.s32.totalorder %s224_s8, %s224_s8 }
  0x1d   :  { %p231_p0 = por %p230_p13, %p229_p12 }
  0x1f   :  { %p232_p1 = pnand %p231_p0, %p225_p11 }
  0x21   :  { %235 = shalt.err (!%p232_p1)
}
  0x22   :  { %34 = dma.hbm_to_vmem [thread:$0]  %s338_s1, 512, %s29_s27, [#allocation6], %s265_s22, %s265_s22, %s266_s23  }
  0x23   :  { %258 = dma.done.wait [#allocation3], 256  }
  0x24   :  { %259 = vsyncadd [#allocation3], 4294967040 }
  0x25   :  { %260 = dma.done.wait [#allocation6], 512  }
  0x26   :  { %261 = vsyncadd [#allocation6], 4294966784  ;;  %vm56_vm0 = vcmask 261120   ;;  %v45_v0 = vld [vmem:[#allocation5] sm:$0xff]  ;;  %v46_v1 = vld [vmem:[#allocation5 + $0x8] sm:$0xff]  ;;  %s268_s11 = smov [#allocation7]  }
  0x27   :  { %v47_v2 = vld [vmem:[#allocation5 + $0x10] sm:$0xff]  ;;  %v179_v3 = vpack.c.bf16 %v46_v1, %v45_v0  ;;  %v48_v4 = vld [vmem:[#allocation5 + $0x18] sm:$0xff]  ;;  %s146_s12 = sshll.u32 %s268_s11, 4  ;;  %vm138_vm1 = vcmask 523264   ;;  %s147_s12 = int_to_ptr.vmem [resolvable:$true] %s146_s12 }
  0x28   :  { %v43_v5 = vld [vmem:[#allocation2] sm:$0xff]  ;;  %v183_v6 = vpack.c.bf16 %v48_v4, %v47_v2  ;;  %v44_v7 = vld [vmem:[#allocation2 + $0x8] sm:$0xff]  ;;  %s236_s13 = scalar_lea.vmem %s147_s12, 256  ;;  %p241_p3 = scmp.lt.s32.totalorder %s147_s12, %s147_s12 }
  0x29   :  { %176 = vmatprep.mubr.msk.f32.mxu0 %vm56_vm0, %v43_v5  ;;  %180 = vmatprep.subr.bf16.mxu0 %v179_v3  ;;  %v159_v8 = vld [vmem:[%s339_s2] ss:$0 sm:$0xff]  ;;  %p237_p2 = scmp.ne.s32.totalorder %s147_s12, %s236_s13  ;;  %p242_p4 = scmp.lt.s32.totalorder %s236_s13, %s236_s13 }
  0x2a   :  { %182 = vmatpush3.bf16.msra.mxu0 %v179_v3 }
  0x2b   :  { %184 = vmatprep.subr.bf16.mxu0 %v183_v6  ;;  %p243_p5 = por %p242_p4, %p241_p3 }
  0x2d   :  { %p244_p6 = pnand %p243_p5, %p237_p2 }
  0x2e   :  { %186 = vmatpush3.bf16.msra.mxu0 %v183_v6 }
  0x31   :  { %177 = vmatmul.mubr.msk.f32.vlgmr.msra.gmra.mrb[0].mxu0 %vm56_vm0, %v44_v7 }
 0x104   :  { %v178_v9 = vpop.f32.mrb[0].mxu0 }
 0x105   :  { %v135_v10 = vadd.f32 %v178_v9, %v159_v8  ;;  %v129_v11 = vpop.f32.mrb[1].mxu0 }
 0x106   :  { %v130_v12 = vadd.f32 %v159_v8, %v129_v11 }
 0x107   :  { %140 = vst.msk [vmem:[#allocation7 + $0x8] sm:$0xff] %vm138_vm1, %v135_v10 }
 0x108   :  { %139 = vst.msk [vmem:[#allocation7] sm:$0xff] %vm138_vm1, %v130_v12 }
 0x109   :  { %247 = shalt.err (!%p244_p6)
}
 0x10a   :  { %s248_s2 = scalar_lea.hbm %s340_s3, 256 }
 0x10b   :  { %p249_p7 = scmp.ne.s32.totalorder %s340_s3, %s248_s2  ;;  %p252_p8 = scmp.lt.u32.totalorder %s248_s2, %s340_s3 }
 0x10d   :  { %p254_p9 = pnand %p252_p8, %p249_p7 }
 0x10f   :  { %257 = shalt.err (!%p254_p9)
}
 0x110   :  { %152 = dma.vmem_to_hbm [thread:$0]  %s147_s12, 256, %s340_s3, [#allocation4], %s265_s22, %s265_s22, %s266_s23  }
 0x111   :  { %262 = dma.done.wait [#allocation4], 256  }
 0x112   :  { %263 = vsyncadd [#allocation4], 4294967040 }
 0x113   :  { %156 = vsyncpa [#allocation3], 1 }
 0x114   :  { %157 = vsyncpa [#allocation6], 1 }
 0x115   :  { %158 = vsyncpa [#allocation4], 1 }

</bundles_post_ra>
